<compile_context>
chip_gen: v5e
topology: v5e:2x2
jax: 0.10.0
libtpu: 0.0.40
codegen_flags: <defaults>
</compile_context>

<pallas_src>
import jax
import jax.numpy as jnp
from jax.experimental import pallas as pl
from jax.experimental.pallas import tpu as pltpu

_MIB = 1024 * 1024
_SMALL_BYTES = 512 * 1024  # below this: one full-extent block, no per-step cost


def _imagenet_norm_kernel(x_ref, loc_ref, inv_scale_ref, o_ref):
    # x_ref / o_ref: (br, bc) tile of the flattened (N*C, H*W) image.
    # loc_ref / inv_scale_ref: (br, 1) per-row f32 channel constants
    # (lane-broadcast by the VPU). Compute in f32, cast only the output.
    x = x_ref[...].astype(jnp.float32)
    o_ref[...] = ((x - loc_ref[...]) * inv_scale_ref[...]).astype(o_ref.dtype)


def _hw_params():
    """(target_block_bytes, vmem_limit_bytes) chosen per TPU generation."""
    vmem_phys = None
    try:
        get_info = getattr(pltpu, "get_tpu_info", None)
        if get_info is not None:
            vmem_phys = getattr(get_info(), "vmem_capacity_bytes", None)
    except Exception:
        vmem_phys = None
    if vmem_phys is None:
        return 4 * _MIB, 32 * _MIB          # unknown chip: safe everywhere
    if vmem_phys <= 64 * _MIB:
        return 6 * _MIB, 48 * _MIB          # v7x: 64 MiB VMEM per TensorCore
    return 8 * _MIB, 64 * _MIB              # v5e / v6e: 128 MiB physical VMEM


def _pick_blocks(rows, cols, itemsize, target_bytes):
    """Choose (block_rows, block_cols).

    Tiling rule: each of the last two block dims is a multiple of the dtype's
    sublane unit / 128 lanes, or equal to the full dim.  Prefers >= 4 (and
    even) grid steps on medium/large inputs for pipelining and 2-TC balance,
    then the largest block that fits `target_bytes` to amortize the ~0.35 us
    per-grid-step overhead.
    """
    total = rows * cols * itemsize
    if total <= _SMALL_BYTES:
        return rows, cols

    unit = max(8, 32 // itemsize)  # 8 for f32, 16 for bf16, 32 for int8/fp8

    row_cands = [r for r in range(unit, rows + 1, unit) if rows % r == 0]
    if not row_cands:
        row_cands = [rows]
    col_cands = [c for c in range(128, cols + 1, 128) if cols % c == 0]
    if not col_cands:
        col_cands = [cols]

    min_steps = 4 if total >= 4 * _SMALL_BYTES else 2

    best_key, best = None, (rows, cols)
    for br in row_cands:
        for bc in col_cands:
            blk = br * bc * itemsize
            steps = (rows // br) * (cols // bc)
            if blk > target_bytes and steps > 1:
                continue  # oversized block (keep only the full-array fallback)
            even = (steps % 2 == 0) or (steps == 1)
            key = (min(steps, min_steps), even, blk)
            if best_key is None or key > best_key:
                best_key, best = key, (br, bc)
    return best


@jax.jit
def imagenet_norm(x, loc, scale):
    """(x - loc) / scale with loc/scale of shape (1, C, 1, 1), x of (N, C, H, W)."""
    N, C, H, W = x.shape
    assert loc.shape == (1, C, 1, 1) and scale.shape == (1, C, 1, 1)
    R, L = N * C, H * W
    itemsize = jnp.dtype(x.dtype).itemsize

    # Free, contiguous reshape to a lane-dense 2D slab.
    x2 = x.reshape(R, L)

    # Per-row f32 constants: row r of the flat view is channel r % C.
    loc_rows = jnp.tile(loc.reshape(1, C).astype(jnp.float32), (N, 1)).reshape(R, 1)
    inv_rows = jnp.tile(
        (1.0 / scale.astype(jnp.float32)).reshape(1, C), (N, 1)
    ).reshape(R, 1)

    target_bytes, vmem_limit = _hw_params()
    br, bc = _pick_blocks(R, L, itemsize, target_bytes)
    grid = (R // br, L // bc)  # exact by construction

    cost = pl.CostEstimate(
        flops=2 * R * L,
        transcendentals=0,
        bytes_accessed=2 * R * L * itemsize + 2 * R * 4,
    )

    out2 = pl.pallas_call(
        _imagenet_norm_kernel,
        out_shape=jax.ShapeDtypeStruct((R, L), x.dtype),
        grid_spec=pltpu.PrefetchScalarGridSpec(
            num_scalar_prefetch=0,
            grid=grid,
            in_specs=[
                pl.BlockSpec((br, bc), lambda i, j: (i, j)),
                pl.BlockSpec((br, 1), lambda i, j: (i, 0)),
                pl.BlockSpec((br, 1), lambda i, j: (i, 0)),
            ],
            out_specs=pl.BlockSpec((br, bc), lambda i, j: (i, j)),
        ),
        compiler_params=pltpu.CompilerParams(
            dimension_semantics=("parallel", "parallel"),
            vmem_limit_bytes=vmem_limit,
        ),
        cost_estimate=cost,
    )(x2, loc_rows, inv_rows)
    return out2.reshape(N, C, H, W)


if __name__ == "__main__":
    # Deterministic buffers from the module's __init__ (ImageNet statistics).
    loc = jnp.array([0.485, 0.456, 0.406], dtype=jnp.float32).reshape(1, 3, 1, 1)
    scale = jnp.array([0.229, 0.224, 0.225], dtype=jnp.float32).reshape(1, 3, 1, 1)

    key = jax.random.PRNGKey(0)
    k1, k2 = jax.random.split(key)

    # Small shape (single full-extent block fast path).
    x_small = jax.random.uniform(k1, (2, 3, 16, 16), dtype=jnp.float32)
    out_small = jax.block_until_ready(imagenet_norm(x_small, loc, scale))
    ref_small = (x_small - loc) / scale
    assert out_small.shape == ref_small.shape and out_small.dtype == ref_small.dtype
    assert jnp.allclose(out_small, ref_small, atol=1e-5, rtol=1e-5)

    # ImageNet-sized shape (exercises the tiled path: (24, 50176) flattened;
    # the block picker produces an even, >=4-step grid for 2-TC balance).
    x_big = jax.random.uniform(k2, (8, 3, 224, 224), dtype=jnp.float32)
    out_big = jax.block_until_ready(imagenet_norm(x_big, loc, scale))
    ref_big = (x_big - loc) / scale
    assert jnp.allclose(out_big, ref_big, atol=1e-5, rtol=1e-5)

    print("KERNEL_OK")
</pallas_src>

<mosaic_0001>
module attributes {stable_mosaic.version = 11 : i64} {
  func.func @_imagenet_norm_kernel(%arg0: i32, %arg1: i32, %arg2: memref<6x256xf32, #tpu.memory_space<vmem>>, %arg3: memref<6x1xf32, #tpu.memory_space<vmem>>, %arg4: memref<6x1xf32, #tpu.memory_space<vmem>>, %arg5: memref<6x256xf32, #tpu.memory_space<vmem>>) attributes {dimension_semantics = [#tpu.dimension_semantics<parallel>, #tpu.dimension_semantics<parallel>], iteration_bounds = array<i64: 1, 1>, scalar_prefetch = 0 : i64, scratch_operands = 0 : i64, tpu.core_type = #tpu.core_type<tc>, window_params = [{transform_indices = @transform_0, window_bounds = array<i64: 6, 256>}, {transform_indices = @transform_1, window_bounds = array<i64: 6, 1>}, {transform_indices = @transform_2, window_bounds = array<i64: 6, 1>}, {transform_indices = @transform_3, window_bounds = array<i64: 6, 256>}]} {
    %c0 = arith.constant 0 : index
    %c0_0 = arith.constant 0 : index
    %0 = vector.load %arg2[%c0, %c0_0] : memref<6x256xf32, #tpu.memory_space<vmem>>, vector<6x256xf32>
    %c0_1 = arith.constant 0 : index
    %c0_2 = arith.constant 0 : index
    %1 = vector.load %arg3[%c0_1, %c0_2] : memref<6x1xf32, #tpu.memory_space<vmem>>, vector<6x1xf32>
    %2 = vector.broadcast %1 : vector<6x1xf32> to vector<6x256xf32>
    %3 = arith.subf %0, %2 : vector<6x256xf32>
    %c0_3 = arith.constant 0 : index
    %c0_4 = arith.constant 0 : index
    %4 = vector.load %arg4[%c0_3, %c0_4] : memref<6x1xf32, #tpu.memory_space<vmem>>, vector<6x1xf32>
    %5 = vector.broadcast %4 : vector<6x1xf32> to vector<6x256xf32>
    %6 = arith.mulf %3, %5 : vector<6x256xf32>
    %c0_5 = arith.constant 0 : index
    %c0_6 = arith.constant 0 : index
    %7 = vector.load %arg5[%c0_5, %c0_6] : memref<6x256xf32, #tpu.memory_space<vmem>>, vector<6x256xf32>
    tpu.vector_store %arg5[%c0_5, %c0_6], %6 {strides = array<i32>} : memref<6x256xf32, #tpu.memory_space<vmem>>, vector<6x256xf32>,
    return
  }
  func.func @transform_0(%arg0: i32, %arg1: i32) -> (i32, i32) {
    %c0_i32 = arith.constant 0 : i32
    return %arg0, %arg1 : i32, i32
  }
  func.func @transform_1(%arg0: i32, %arg1: i32) -> (i32, i32) {
    %c0_i32 = arith.constant 0 : i32
    %c0_i32_0 = arith.constant 0 : i32
    return %arg0, %c0_i32 : i32, i32
  }
  func.func @transform_2(%arg0: i32, %arg1: i32) -> (i32, i32) {
    %c0_i32 = arith.constant 0 : i32
    %c0_i32_0 = arith.constant 0 : i32
    return %arg0, %c0_i32 : i32, i32
  }
  func.func @transform_3(%arg0: i32, %arg1: i32) -> (i32, i32) {
    %c0_i32 = arith.constant 0 : i32
    return %arg0, %arg1 : i32, i32
  }
}

</mosaic_0001>

<bundles_post_ra>
// kernel: tile.14
= control target key start
LH: loop header
LB: loop body
LE: loop exit
PB: predicated region body
PF: predicated region fallthrough
CT: control target
= control target key end

     0   :  { %s22_s0 = inlined_call_operand.vmem [shape: f32[3], index: 0, kind: input, shape index: {}]   ;;  %s23_s1 = inlined_call_operand.vmem [shape: f32[2,1,1,3], index: 1, kind: output, shape index: {}]  }
   0x1   :  { %v4_v0 = vld [vmem:[%s22_s0] ss:$0 sm:$0xff] }
   0x2   :  { %5 = vst [vmem:[%s23_s1] sm:$0x3] %v4_v0 }

// kernel: tile.0
= control target key start
LH: loop header
LB: loop body
LE: loop exit
PB: predicated region body
PF: predicated region fallthrough
CT: control target
= control target key end

     0   :  { %s26_s8 = smov 126   ;;  %vm7_vm0 = vcmask 7168   ;;  %s49_s0 = inlined_call_operand.vmem [shape: f32[2,1,1,3], index: 0, kind: input, shape index: {}]   ;;  %s50_s1 = inlined_call_operand.vmem [shape: f32[6,1], index: 1, kind: output, shape index: {}]  }
   0x1   :  { %v4_v0 = vld [vmem:[%s49_s0] sm:$0x3]  ;;  %s25_s0 = smov 127  }
   0x2   :  { %5 = vst [vmem:[#allocation0] sm:$0x3] %v4_v0 }
   0x9   :  { %v9_v1 = vld [vmem:[#allocation0] sm:$0x3]  }
   0xa   :  { %10 = vrot.lane.b32.xlu0 %v9_v1, %s25_s0  ;;  %v15_v2 = vld [vmem:[#allocation0] sm:$0x3]  }
   0xb   :  { %v6_v3 = vld [vmem:[#allocation0] sm:$0x3]  }
   0xc   :  { %8 = vst.msk [vmem:[%s50_s1] ss:$3 sm:$0x3] %vm7_vm0, %v6_v3  }
  0x12   :  { %16 = vrot.lane.b32.xlu0 %v15_v2, %s26_s8 }
  0x7c   :  { %v11_v4 = vpop.permute.xlu0 %10  }
  0x7d   :  { %21 = vst.msk [vmem:[%s50_s1 + $0x1] ss:$3 sm:$0x3] %vm7_vm0, %v11_v4  }
  0x84   :  { %v17_v5 = vpop.permute.xlu0 %16  }
  0x85   :  { %22 = vst.msk [vmem:[%s50_s1 + $0x2] ss:$3 sm:$0x3] %vm7_vm0, %v17_v5  }

// kernel: imagenet_norm.1
= control target key start
LH: loop header
LB: loop body
LE: loop exit
PB: predicated region body
PF: predicated region fallthrough
CT: control target
= control target key end

     0   :  { %v40_v0 = vmov 0   ;;  %s79_s1 = inlined_call_operand.vmem [shape: f32[6,1], index: 1, kind: input, shape index: {}]   ;;  %s80_s2 = inlined_call_operand.vmem [shape: f32[6,1], index: 2, kind: input, shape index: {}]   ;;  %s81_s0 = inlined_call_operand.vmem [shape: f32[6,256], index: 0, kind: input, shape index: {}]   ;;  %s82_s3 = inlined_call_operand.vmem [shape: f32[6,256], index: 3, kind: output, shape index: {}]  }
   0x1   :  { %39 = vset.pattern.permute.xlu0 %v40_v0  ;;  %v16_v1 = vld [vmem:[%s79_s1] sm:$0x3f]  ;;  %v15_v5 = vld [vmem:[%s81_s0 + $0x8] sm:$0x3f] }
   0x2   :  { %19 = vperm.xlu0 %39, %v16_v1   ;;  %v24_v2 = vld [vmem:[%s80_s2] sm:$0x3f] }
   0x3   :  { %v14_v4 = vld [vmem:[%s81_s0] sm:$0x3f] }
   0xa   :  { %27 = vperm.xlu0 %39, %v24_v2  }
  0x74   :  { %v20_v3 = vpop.permute.xlu0 %19 }
  0x75   :  { %v22_v6 = vsub.f32 %v14_v4, %v20_v3  ;;  %v23_v7 = vsub.f32 %v15_v5, %v20_v3 }
  0x7c   :  { %v28_v8 = vpop.permute.xlu0 %27 }
  0x7d   :  { %v30_v9 = vmul.f32 %v28_v8, %v22_v6  ;;  %v31_v10 = vmul.f32 %v28_v8, %v23_v7 }
  0x7f   :  { %32 = vst [vmem:[%s82_s3] sm:$0x3f] %v30_v9 }
  0x80   :  { %33 = vst [vmem:[%s82_s3 + $0x8] sm:$0x3f] %v31_v10 }

</bundles_post_ra>
